<compile_context>
chip_gen: v7x
topology: tpu7x:2x2x1
jax: 0.10.0
libtpu: 0.0.40
codegen_flags: <defaults>
</compile_context>

<pallas_src>
import jax
import jax.numpy as jnp
from jax.experimental import pallas as pl
from jax.experimental.pallas import tpu as pltpu


def _maxpool_kernel(x_ref, m_ref, o_ref, acc_ref):
    # x_ref:   (TB, TS, H)   input block
    # m_ref:   (TB, TS)      pre-gathered 0/1 mask block (same dtype as x)
    # o_ref:   (TB, H)       lane-dense output block (resident across seq axis)
    # acc_ref: (TB, H) f32   running max accumulator (VMEM scratch)
    k = pl.program_id(1)

    @pl.when(k == 0)
    def _init():
        acc_ref[...] = jnp.full_like(acc_ref, -jnp.inf)

    masked = x_ref[...] * m_ref[...][:, :, None]            # broadcast over hidden
    blk_max = jnp.max(masked, axis=1)                        # (TB, H), reduce seq
    acc_ref[...] = jnp.maximum(acc_ref[...], blk_max.astype(jnp.float32))

    @pl.when(k == pl.num_programs(1) - 1)
    def _finalize():
        o_ref[...] = acc_ref[...].astype(o_ref.dtype)


def max_pooler(x, indxs, mask_table, *, target_block_bytes=2 * 1024 * 1024):
    """x: (B, S, H), indxs: (B,) int, mask_table: (NUM_MASKS, S) -> (B, H).

    Computes max_s( x[b, s, :] * mask_table[indxs[b], s] ), matching the
    PyTorch module (masked positions contribute 0 to the max).
    """
    B, S, H = x.shape
    out_dtype = x.dtype
    itemsize = x.dtype.itemsize

    # Pre-gather + cast the mask rows in plain XLA (trivially cheap) so the
    # kernel can block over many batch rows per grid step.
    mask = mask_table[indxs].astype(x.dtype)                 # (B, S)

    # --- sequence tiling -------------------------------------------------
    # Only tile the sequence when it is long; seq tiles must be a multiple of
    # 128 (mask block lane constraint) and 8 (x block sublane constraint).
    if S > 1024:
        TS = 512
    else:
        TS = S
    S_pad = pl.cdiv(S, TS) * TS

    # --- batch tiling ----------------------------------------------------
    # Aim for ~target_block_bytes of x per block; sublane-align TB when it
    # does not cover the whole batch.
    rows = max(1, target_block_bytes // (TS * H * itemsize))
    TB = min(B, int(rows))
    if TB < B:
        TB = max(8, (TB // 8) * 8)
    B_pad = pl.cdiv(B, TB) * TB

    # --- padding (exactness-preserving) -----------------------------------
    # Seq padding: x = -inf, mask = 1  -> product = -inf, never wins the max.
    # Batch padding: x = 0, mask = 0   -> harmless, rows sliced off afterwards.
    if S_pad != S:
        x = jnp.concatenate(
            [x, jnp.full((B, S_pad - S, H), -jnp.inf, dtype=x.dtype)], axis=1)
        mask = jnp.concatenate(
            [mask, jnp.ones((B, S_pad - S), dtype=mask.dtype)], axis=1)
    if B_pad != B:
        x = jnp.concatenate(
            [x, jnp.zeros((B_pad - B, S_pad, H), dtype=x.dtype)], axis=0)
        mask = jnp.concatenate(
            [mask, jnp.zeros((B_pad - B, S_pad), dtype=mask.dtype)], axis=0)

    grid = (B_pad // TB, S_pad // TS)                        # reduction axis last

    out = pl.pallas_call(
        _maxpool_kernel,
        out_shape=jax.ShapeDtypeStruct((B_pad, H), out_dtype),
        grid=grid,
        in_specs=[
            pl.BlockSpec((TB, TS, H), lambda i, k: (i, k, 0)),
            pl.BlockSpec((TB, TS), lambda i, k: (i, k)),
        ],
        out_specs=pl.BlockSpec((TB, H), lambda i, k: (i, 0)),
        scratch_shapes=[pltpu.VMEM((TB, H), jnp.float32)],
        compiler_params=pltpu.CompilerParams(
            dimension_semantics=("parallel", "arbitrary"),
            vmem_limit_bytes=32 * 1024 * 1024,
        ),
    )(x, mask)

    return out[:B] if B_pad != B else out


if __name__ == "__main__":
    B, S, H = 2, 8, 32
    NUM_MASKS = 6

    key = jax.random.PRNGKey(0)
    (kx,) = jax.random.split(key, 1)

    # NOTE: cast x (and mask) to bf16 here for a ~2x HBM-bandwidth win if the
    # model tolerates it; kept f32 for an exact check against the reference.
    x = jax.random.normal(kx, (B, S, H), dtype=jnp.float32)

    # Deterministic synthetic tokenizer mask table: row i valid for lengths[i].
    lengths = jnp.array([3, 5, 8, 2, 7, 4], dtype=jnp.int32)
    pos = jnp.arange(S, dtype=jnp.int32)
    mask_table = (pos[None, :] < lengths[:, None]).astype(jnp.float32)  # (NUM_MASKS, S)

    indxs = jnp.array([3, 1], dtype=jnp.int32)

    out = max_pooler(x, indxs, mask_table)
    out = jax.block_until_ready(out)

    # Reference (plain JAX) check of the PyTorch semantics.
    ref = jnp.max(x * mask_table[indxs][:, :, None], axis=1)
    assert out.shape == (B, H)
    assert jnp.allclose(out, ref, atol=1e-6), "mismatch vs reference"

    print("KERNEL_OK")
</pallas_src>

<mosaic_0001>
module attributes {stable_mosaic.version = 11 : i64} {
  func.func @_maxpool_kernel(%arg0: i32, %arg1: i32, %arg2: memref<2x8x32xf32, #tpu.memory_space<vmem>>, %arg3: memref<2x8xf32, #tpu.memory_space<vmem>>, %arg4: memref<2x32xf32, #tpu.memory_space<vmem>>, %arg5: memref<2x32xf32, #tpu.memory_space<vmem>>) attributes {dimension_semantics = [#tpu.dimension_semantics<parallel>, #tpu.dimension_semantics<arbitrary>], iteration_bounds = array<i64: 1, 1>, scalar_prefetch = 0 : i64, scratch_operands = 1 : i64, tpu.core_type = #tpu.core_type<tc>, window_params = [{transform_indices = @transform_0, window_bounds = array<i64: 2, 8, 32>}, {transform_indices = @transform_1, window_bounds = array<i64: 2, 8>}, {transform_indices = @transform_2, window_bounds = array<i64: 2, 32>}]} {
    %c0_i32 = arith.constant 0 : i32
    %0 = arith.cmpi eq, %arg1, %c0_i32 : i32
    %1 = arith.extui %0 : i1 to i32
    %c0_i32_0 = arith.constant 0 : i32
    %2 = arith.cmpi ne, %1, %c0_i32_0 : i32
    scf.if %2 {
      %cst_11 = arith.constant 0xFF800000 : f32
      %15 = vector.broadcast %cst_11 : f32 to vector<2x32xf32>
      %c0_12 = arith.constant 0 : index
      %c0_13 = arith.constant 0 : index
      %16 = vector.load %arg5[%c0_12, %c0_13] : memref<2x32xf32, #tpu.memory_space<vmem>>, vector<2x32xf32>
      tpu.vector_store %arg5[%c0_12, %c0_13], %15 {strides = array<i32>} : memref<2x32xf32, #tpu.memory_space<vmem>>, vector<2x32xf32>,
    } else {
    }
    %c0 = arith.constant 0 : index
    %c0_1 = arith.constant 0 : index
    %c0_2 = arith.constant 0 : index
    %3 = vector.load %arg2[%c0, %c0_1, %c0_2] : memref<2x8x32xf32, #tpu.memory_space<vmem>>, vector<2x8x32xf32>
    %c0_3 = arith.constant 0 : index
    %c0_4 = arith.constant 0 : index
    %4 = vector.load %arg3[%c0_3, %c0_4] : memref<2x8xf32, #tpu.memory_space<vmem>>, vector<2x8xf32>
    %5 = vector.shape_cast %4 : vector<2x8xf32> to vector<2x8x1xf32>
    %6 = vector.broadcast %5 : vector<2x8x1xf32> to vector<2x8x32xf32>
    %7 = arith.mulf %3, %6 : vector<2x8x32xf32>
    %cst = arith.constant dense<0xFF800000> : vector<2x32xf32>
    %8 = vector.multi_reduction <maximumf>, %7, %cst [1] : vector<2x8x32xf32> to vector<2x32xf32>
    %c0_5 = arith.constant 0 : index
    %c0_6 = arith.constant 0 : index
    %9 = vector.load %arg5[%c0_5, %c0_6] : memref<2x32xf32, #tpu.memory_space<vmem>>, vector<2x32xf32>
    %10 = arith.maximumf %9, %8 : vector<2x32xf32>
    %c0_7 = arith.constant 0 : index
    %c0_8 = arith.constant 0 : index
    %11 = vector.load %arg5[%c0_7, %c0_8] : memref<2x32xf32, #tpu.memory_space<vmem>>, vector<2x32xf32>
    tpu.vector_store %arg5[%c0_7, %c0_8], %10 {strides = array<i32>} : memref<2x32xf32, #tpu.memory_space<vmem>>, vector<2x32xf32>,
    %c0_i32_9 = arith.constant 0 : i32
    %12 = arith.cmpi eq, %arg1, %c0_i32_9 : i32
    %13 = arith.extui %12 : i1 to i32
    %c0_i32_10 = arith.constant 0 : i32
    %14 = arith.cmpi ne, %13, %c0_i32_10 : i32
    scf.if %14 {
      %c0_11 = arith.constant 0 : index
      %c0_12 = arith.constant 0 : index
      %15 = vector.load %arg5[%c0_11, %c0_12] : memref<2x32xf32, #tpu.memory_space<vmem>>, vector<2x32xf32>
      %c0_13 = arith.constant 0 : index
      %c0_14 = arith.constant 0 : index
      %16 = vector.load %arg4[%c0_13, %c0_14] : memref<2x32xf32, #tpu.memory_space<vmem>>, vector<2x32xf32>
      tpu.vector_store %arg4[%c0_13, %c0_14], %15 {strides = array<i32>} : memref<2x32xf32, #tpu.memory_space<vmem>>, vector<2x32xf32>,
    } else {
    }
    return
  }
  func.func @transform_0(%arg0: i32, %arg1: i32) -> (i32, i32, i32) {
    %c0_i32 = arith.constant 0 : i32
    %c0_i32_0 = arith.constant 0 : i32
    return %arg0, %arg1, %c0_i32 : i32, i32, i32
  }
  func.func @transform_1(%arg0: i32, %arg1: i32) -> (i32, i32) {
    %c0_i32 = arith.constant 0 : i32
    return %arg0, %arg1 : i32, i32
  }
  func.func @transform_2(%arg0: i32, %arg1: i32) -> (i32, i32) {
    %c0_i32 = arith.constant 0 : i32
    %c0_i32_0 = arith.constant 0 : i32
    return %arg0, %c0_i32 : i32, i32
  }
}

</mosaic_0001>

<bundles_post_ra>
// kernel: tpu_custom_call.1
= control target key start
LH: loop header
LB: loop body
LE: loop exit
PB: predicated region body
PF: predicated region fallthrough
CT: control target
= control target key end

     0   :  { %7 = vsyncpa [#allocation4], 0  ;;  %s198_s0 = inlined_call_operand.hbm [shape: f32[2,8,32], index: 0, kind: input, shape index: {}]   ;;  %s199_s1 = inlined_call_operand.vmem [shape: f32[2,8], index: 1, kind: input, shape index: {}]   ;;  %s200_s2 = inlined_call_operand.hbm [shape: f32[2,32], index: 2, kind: output, shape index: {}]  }
   0x1   :  { %8 = vsyncpa [#allocation5], 0  ;;  %s148_s9 = smov [#allocation3]   ;;  %s100_s13 = scalar_lea.hbm %s198_s0, 256 }
   0x2   :  { %s14_s10 = sshll.u32 %s148_s9, 4  ;;  %p101_p0 = scmp.ne.s32.totalorder %s198_s0, %s100_s13  ;;  %s15_s10 = int_to_ptr.vmem [resolvable:$true] %s14_s10 }
   0x3   :  { %p104_p1 = scmp.lt.u32.totalorder %s100_s13, %s198_s0 }
   0x5   :  { %p106_p2 = pnand %p104_p1, %p101_p0 }
   0x7   :  { %109 = shalt.err (!%p106_p2)
}
   0x8   :  { %s110_s18 = scalar_lea.vmem %s15_s10, 256  ;;  %p115_p4 = scmp.lt.s32.totalorder %s15_s10, %s15_s10 }
   0x9   :  { %p111_p3 = scmp.ne.s32.totalorder %s15_s10, %s110_s18  ;;  %p116_p5 = scmp.lt.s32.totalorder %s110_s18, %s110_s18 }
   0xb   :  { %p117_p6 = por %p116_p5, %p115_p4 }
   0xd   :  { %p118_p7 = pnand %p117_p6, %p111_p3 }
   0xf   :  { %121 = shalt.err (!%p118_p7)
}
  0x10   :  { %s149_s19 = smov 128   ;;  %s150_s20 = smov 8  }
  0x11   :  { %20 = dma.hbm_to_vmem [thread:$0]  %s198_s0, 256, %s15_s10, [#allocation4], %s149_s19, %s149_s19, %s150_s20  }
  0x12   :  { %144 = dma.done.wait [#allocation4], 256  }
  0x13   :  { %145 = vsyncadd [#allocation4], 4294967040  ;;  %v35_v0 = vlaneseq  ;;  %v34_v4 = vld [vmem:[%s199_s1] sm:$0x3]  ;;  %vm30_vm0 = vcmask 254976   ;;  %v151_v6 = vmov -inf  }
  0x14   :  { %31 = vst.msk [vmem:[#allocation2] sm:$0x3] %vm30_vm0, %v151_v6  ;;  %v32_v8 = vld [vmem:[#allocation3] sm:$0xff]  ;;  %vm51_vm1 = vcmask 261120   ;;  %v33_v11 = vld [vmem:[#allocation3 + $0x8] sm:$0xff]  ;;  %vm69_vm2 = vcmask 1041409  }
  0x15   :  { %v36_v1 = vshrl.u32 %v35_v0, 7  ;;  %s152_s0 = smov [#allocation6]  }
  0x16   :  { %s86_s1 = sshll.u32 %s152_s0, 4  ;;  %s87_s1 = int_to_ptr.vmem [resolvable:$true] %s86_s1 }
  0x17   :  { %v37_v2 = vsub.s32 0, %v36_v1  ;;  %v44_v3 = vsub.s32 1, %v36_v1  ;;  %s122_s25 = scalar_lea.vmem %s87_s1, 32  ;;  %p127_p9 = scmp.lt.s32.totalorder %s87_s1, %s87_s1 }
  0x18   :  { %p123_p8 = scmp.ne.s32.totalorder %s87_s1, %s122_s25  ;;  %p128_p10 = scmp.lt.s32.totalorder %s122_s25, %s122_s25 }
  0x19   :  { %v38_v5 = vrot.slane %v34_v4, %v37_v2  ;;  %v45_v7 = vrot.slane %v34_v4, %v44_v3 }
  0x1a   :  { %p129_p11 = por %p128_p10, %p127_p9 }
  0x1b   :  { %40 = vbcast.lane.b32.xlu0 %v38_v5, 256  ;;  %v66_v28 = vld [vmem:[#allocation2] sm:$0x3] }
  0x1c   :  { %p130_p12 = pnand %p129_p11, %p123_p8 }
  0x1f   :  { %47 = vbcast.lane.b32.xlu0 %v45_v7, 256 }
  0x8d   :  { %v41_v9 = vpop.permute.xlu0 %40 }
  0x8e   :  { %v49_v10 = vmul.f32 %v41_v9, %v32_v8 }
  0x90   :  { %v52_v12 = vsel %vm51_vm1, %v49_v10, -inf }
  0x91   :  { %v53_v13 = vrot.slane %v52_v12, 4  ;;  %v48_v14 = vpop.permute.xlu0 %47 }
  0x92   :  { %v50_v15 = vmul.f32 %v48_v14, %v33_v11 }
  0x93   :  { %v54_v16 = vmax.f32 %v52_v12, %v53_v13 }
  0x94   :  { %v59_v17 = vsel %vm51_vm1, %v50_v15, -inf }
  0x95   :  { %v55_v18 = vrot.slane %v54_v16, 2  ;;  %v60_v19 = vrot.slane %v59_v17, 4 }
  0x97   :  { %v56_v20 = vmax.f32 %v54_v16, %v55_v18  ;;  %v61_v21 = vmax.f32 %v59_v17, %v60_v19 }
  0x99   :  { %v62_v22 = vrot.slane %v61_v21, 2  ;;  %v57_v23 = vrot.slane %v56_v20, 1 }
  0x9b   :  { %v63_v24 = vmax.f32 %v61_v21, %v62_v22  ;;  %v58_v26 = vmax.f32 %v56_v20, %v57_v23 }
  0x9d   :  { %v64_v25 = vrot.slane %v63_v24, 1 }
  0x9f   :  { %v65_v27 = vmax.f32 %v63_v24, %v64_v25 }
  0xa1   :  { %v70_v29 = vsel %vm69_vm2, %v65_v27, %v58_v26 }
  0xa2   :  { %v72_v30 = vmax.f32 %v66_v28, %v70_v29 }
  0xa4   :  { %74 = vst.msk [vmem:[#allocation2] sm:$0x3] %vm30_vm0, %v72_v30 }
  0xab   :  { %v78_v31 = vld [vmem:[#allocation2] sm:$0x3] }
  0xac   :  { %79 = vst.msk [vmem:[#allocation6] sm:$0x3] %vm30_vm0, %v78_v31 }
  0xad   :  { %133 = shalt.err (!%p130_p12)
}
  0xae   :  { %s134_s28 = scalar_lea.hbm %s200_s2, 32 }
  0xaf   :  { %p135_p13 = scmp.ne.s32.totalorder %s200_s2, %s134_s28  ;;  %p138_p0 = scmp.lt.u32.totalorder %s134_s28, %s200_s2 }
  0xb1   :  { %p140_p1 = pnand %p138_p0, %p135_p13 }
  0xb3   :  { %143 = shalt.err (!%p140_p1)
}
  0xb4   :  { %89 = dma.vmem_to_hbm [thread:$0]  %s87_s1, 32, %s200_s2, [#allocation5]  }
  0xb5   :  { %146 = dma.done.wait [#allocation5], 32  }
  0xb6   :  { %147 = vsyncadd [#allocation5], 4294967264 }
  0xb7   :  { %93 = vsyncpa [#allocation4], 1 }
  0xb8   :  { %94 = vsyncpa [#allocation5], 1 }

</bundles_post_ra>
